<compile_context>
chip_gen: v6e
topology: v6e:2x2x1
jax: 0.10.0
libtpu: 0.0.40
codegen_flags: <defaults>
</compile_context>

<pallas_src>
import math
import functools

import jax
import jax.numpy as jnp
from jax.experimental import pallas as pl
from jax.experimental.pallas import tpu as pltpu


def _round_up(v, m):
    return ((v + m - 1) // m) * m


def _conv_tile(x_main_ref, x_halo_ref, w_ref, xbuf):
    """Conv for one (TL, C_out_pad) tile: K shifted matmuls, f32 accumulate."""
    tl = x_main_ref.shape[1]
    k_taps = w_ref.shape[0]
    c_out = w_ref.shape[2]
    # Stitch main tile + halo rows into one contiguous VMEM buffer so every
    # tap is a plain shifted (TL, C_in) slice fed straight to the MXU.
    xbuf[0:tl, :] = x_main_ref[0]
    xbuf[tl:, :] = x_halo_ref[0]
    acc = jnp.zeros((tl, c_out), jnp.float32)
    for k in range(k_taps):  # K is small & static -> unrolled
        acc = acc + jnp.dot(xbuf[k:k + tl, :], w_ref[k],
                            preferred_element_type=jnp.float32)
    return acc


def _stats_kernel(x_main_ref, x_halo_ref, w_ref, sum_ref, sq_ref, xbuf, *,
                  l_out, l_tile):
    """Pass 1: accumulate per-channel sum / sum-of-squares of the conv output."""
    l = pl.program_id(1)

    @pl.when(l == 0)
    def _():
        sum_ref[...] = jnp.zeros_like(sum_ref)
        sq_ref[...] = jnp.zeros_like(sq_ref)

    acc = _conv_tile(x_main_ref, x_halo_ref, w_ref, xbuf)
    # Mask rows beyond the true output length (L-tile padding rows).
    row = l * l_tile + jax.lax.broadcasted_iota(jnp.int32, (l_tile, 1), 0)
    valid = (row < l_out).astype(jnp.float32)
    accv = acc * valid
    sum_ref[0] += jnp.sum(accv, axis=0, keepdims=True)
    sq_ref[0] += jnp.sum(accv * acc, axis=0, keepdims=True)


def _norm_kernel(x_main_ref, x_halo_ref, w_ref, scale_ref, shift_ref, o_ref,
                 xbuf):
    """Pass 2: conv (recomputed) -> folded BN affine -> SiLU, lane-dense stores."""
    acc = _conv_tile(x_main_ref, x_halo_ref, w_ref, xbuf)
    y = acc * scale_ref[...] + shift_ref[...]
    o_ref[0] = (y * jax.nn.sigmoid(y)).astype(o_ref.dtype)


def conv_layer_forward(x_ncl, weight_oik, gamma, beta, *, stride=1, eps=1e-5,
                       l_tile=512):
    """ConvLayer.forward: Conv1dSame(bias=False) -> BatchNorm1d -> SiLU.

    x_ncl:      (N, C_in, L)       float32, PyTorch NCL layout
    weight_oik: (C_out, C_in, K)   PyTorch Conv1d weight layout (groups == 1)
    gamma/beta: (C_out,)           BatchNorm affine parameters
    returns:    (N, C_out, L)      NCL layout, float32
    """
    N, C_in, L = x_ncl.shape
    C_out, C_in_g, K = weight_oik.shape
    assert C_in_g == C_in, "groups != 1 not supported"  # TODO(synk): grouped conv
    assert stride == 1  # TODO(synk): stride > 1 (strided tap gather) not implemented

    # TF-style SAME padding (dilation = 1; with stride = 1 -> L_out == L).
    pad_w = max((math.ceil(L / stride) - 1) * stride + (K - 1) + 1 - L, 0)
    pad_l = pad_w // 2
    L_out = L

    halo = max(8, _round_up(K - 1, 8))         # halo rows, sublane aligned
    TL = _round_up(min(l_tile, L_out), halo)   # row tile: multiple of halo (and 8)
    n_l = (L_out + TL - 1) // TL
    L_out_pad = n_l * TL
    L_buf = L_out_pad + halo                   # padded input length the kernel sees
    C_out_pad = _round_up(C_out, 128)          # lane-dense output stores

    # Layout glue: NCL -> NLC (channels-last), bf16 for the MXU, SAME padding.
    # TODO(synk): read NCL directly / emit NCL from the kernel to drop these
    # wrapper transposes (an extra HBM round trip for the activations).
    x_nlc = jnp.transpose(x_ncl, (0, 2, 1)).astype(jnp.bfloat16)
    x_buf = jnp.pad(x_nlc, ((0, 0), (pad_l, L_buf - L - pad_l), (0, 0)))
    w_kio = jnp.transpose(weight_oik, (2, 1, 0)).astype(jnp.bfloat16)
    w_kio = jnp.pad(w_kio, ((0, 0), (0, 0), (0, C_out_pad - C_out)))
    gamma_p = jnp.pad(gamma.astype(jnp.float32), (0, C_out_pad - C_out))
    beta_p = jnp.pad(beta.astype(jnp.float32), (0, C_out_pad - C_out))

    x_main_spec = pl.BlockSpec((1, TL, C_in), lambda n, l: (n, l, 0))
    x_halo_spec = pl.BlockSpec((1, halo, C_in),
                               lambda n, l: (n, (l + 1) * (TL // halo), 0))
    w_spec = pl.BlockSpec((K, C_in, C_out_pad), lambda n, l: (0, 0, 0))
    vec_spec = pl.BlockSpec((1, C_out_pad), lambda n, l: (0, 0))
    stat_spec = pl.BlockSpec((1, 1, C_out_pad), lambda n, l: (n, 0, 0))

    # ---- pass 1: per-channel sum / sumsq of the conv output (accumulators) ----
    sums, sqs = pl.pallas_call(
        functools.partial(_stats_kernel, l_out=L_out, l_tile=TL),
        out_shape=(jax.ShapeDtypeStruct((N, 1, C_out_pad), jnp.float32),
                   jax.ShapeDtypeStruct((N, 1, C_out_pad), jnp.float32)),
        grid=(N, n_l),
        in_specs=[x_main_spec, x_halo_spec, w_spec],
        out_specs=(stat_spec, stat_spec),
        scratch_shapes=[pltpu.VMEM((TL + halo, C_in), jnp.bfloat16)],
        compiler_params=pltpu.CompilerParams(
            dimension_semantics=("parallel", "arbitrary"),
            vmem_limit_bytes=32 * 1024 * 1024),
    )(x_buf, x_buf, w_kio)

    # BN training-mode batch statistics (biased variance), folded into a single
    # per-channel scale/shift so pass 2 does one multiply-add per element.
    cnt = jnp.float32(N * L_out)
    s = jnp.sum(sums[:, 0, :], axis=0)
    ss = jnp.sum(sqs[:, 0, :], axis=0)
    mean = s / cnt
    var = jnp.maximum(ss / cnt - mean * mean, 0.0)
    inv = jax.lax.rsqrt(var + eps)
    scale = (gamma_p * inv).reshape(1, C_out_pad)
    shift = (beta_p - mean * gamma_p * inv).reshape(1, C_out_pad)

    # ---- pass 2: conv (recomputed) + BN affine + SiLU ----
    out = pl.pallas_call(
        _norm_kernel,
        out_shape=jax.ShapeDtypeStruct((N, L_out_pad, C_out_pad), jnp.float32),
        grid=(N, n_l),
        in_specs=[x_main_spec, x_halo_spec, w_spec, vec_spec, vec_spec],
        out_specs=pl.BlockSpec((1, TL, C_out_pad), lambda n, l: (n, l, 0)),
        scratch_shapes=[pltpu.VMEM((TL + halo, C_in), jnp.bfloat16)],
        compiler_params=pltpu.CompilerParams(
            dimension_semantics=("parallel", "parallel"),
            vmem_limit_bytes=32 * 1024 * 1024),
    )(x_buf, x_buf, w_kio, scale, shift)

    y = out[:, :L_out, :C_out]
    return jnp.transpose(y, (0, 2, 1))  # back to NCL


def _reference_forward(x_ncl, weight_oik, gamma, beta, *, stride=1, eps=1e-5):
    """Pure-JAX f32 reference (mirrors the PyTorch module in training mode)."""
    N, C_in, L = x_ncl.shape
    C_out, _, K = weight_oik.shape
    pad_w = max((math.ceil(L / stride) - 1) * stride + (K - 1) + 1 - L, 0)
    x_pad = jnp.pad(x_ncl, ((0, 0), (0, 0), (pad_w // 2, pad_w - pad_w // 2)))
    y = jax.lax.conv_general_dilated(
        x_pad, weight_oik, window_strides=(stride,), padding="VALID",
        dimension_numbers=("NCH", "OIH", "NCH"))
    mean = y.mean(axis=(0, 2), keepdims=True)
    var = ((y - mean) ** 2).mean(axis=(0, 2), keepdims=True)
    yn = (y - mean) / jnp.sqrt(var + eps)
    yn = yn * gamma[None, :, None] + beta[None, :, None]
    return yn * jax.nn.sigmoid(yn)


if __name__ == "__main__":
    # Small shapes: batch=2, in_channels=4, out_channels=8, kernel_size=3, L=16.
    N, C_in, C_out, K, L = 2, 4, 8, 3, 16

    key = jax.random.PRNGKey(0)
    k_x, k_w, k_g, k_b = jax.random.split(key, 4)

    x = jax.random.normal(k_x, (N, C_in, L), dtype=jnp.float32)
    # Conv1d default init range ~ U(-1/sqrt(fan_in), 1/sqrt(fan_in))
    bound = 1.0 / math.sqrt(C_in * K)
    weight = jax.random.uniform(k_w, (C_out, C_in, K), minval=-bound, maxval=bound,
                                dtype=jnp.float32)
    gamma = jax.random.uniform(k_g, (C_out,), minval=0.5, maxval=1.5, dtype=jnp.float32)
    beta = jax.random.normal(k_b, (C_out,), dtype=jnp.float32) * 0.1

    out = conv_layer_forward(x, weight, gamma, beta)
    out = jax.block_until_ready(out)

    ref = _reference_forward(x, weight, gamma, beta)
    assert out.shape == ref.shape == (N, C_out, L)
    # Kernel feeds the MXU bf16 inputs (f32 accumulate), so compare against the
    # f32 reference with a bf16-appropriate tolerance.
    err = float(jnp.max(jnp.abs(out - ref)))
    assert jnp.allclose(out, ref, atol=5e-2, rtol=5e-2), f"max abs err {err}"

    print("KERNEL_OK")
</pallas_src>

<mosaic_0001>
module attributes {stable_mosaic.version = 11 : i64} {
  func.func @_stats_kernel(%arg0: i32, %arg1: i32, %arg2: memref<1x16x4xbf16, #tpu.memory_space<vmem>>, %arg3: memref<1x8x4xbf16, #tpu.memory_space<vmem>>, %arg4: memref<3x4x128xbf16, #tpu.memory_space<vmem>>, %arg5: memref<1x1x128xf32, #tpu.memory_space<vmem>>, %arg6: memref<1x1x128xf32, #tpu.memory_space<vmem>>, %arg7: memref<24x4xbf16, #tpu.memory_space<vmem>>) attributes {dimension_semantics = [#tpu.dimension_semantics<parallel>, #tpu.dimension_semantics<arbitrary>], iteration_bounds = array<i64: 2, 1>, scalar_prefetch = 0 : i64, scratch_operands = 1 : i64, tpu.core_type = #tpu.core_type<tc>, window_params = [{transform_indices = @transform_0, window_bounds = array<i64: 1, 16, 4>}, {transform_indices = @transform_1, window_bounds = array<i64: 1, 8, 4>}, {pipeline_mode = #tpu.pipeline_mode<synchronous>, transform_indices = @transform_2, window_bounds = array<i64: 3, 4, 128>}, {transform_indices = @transform_3, window_bounds = array<i64: 1, 1, 128>}, {transform_indices = @transform_4, window_bounds = array<i64: 1, 1, 128>}]} {
    %c0_i32 = arith.constant 0 : i32
    %0 = arith.cmpi eq, %arg1, %c0_i32 : i32
    %1 = arith.extui %0 : i1 to i32
    %c0_i32_0 = arith.constant 0 : i32
    %2 = arith.cmpi ne, %1, %c0_i32_0 : i32
    scf.if %2 {
      %cst_40 = arith.constant 0.000000e+00 : f32
      %52 = vector.broadcast %cst_40 : f32 to vector<1x1x128xf32>
      %c0_41 = arith.constant 0 : index
      %c0_42 = arith.constant 0 : index
      %c0_43 = arith.constant 0 : index
      %53 = vector.load %arg5[%c0_41, %c0_42, %c0_43] : memref<1x1x128xf32, #tpu.memory_space<vmem>>, vector<1x1x128xf32>
      tpu.vector_store %arg5[%c0_41, %c0_42, %c0_43], %52 {strides = array<i32>} : memref<1x1x128xf32, #tpu.memory_space<vmem>>, vector<1x1x128xf32>,
      %cst_44 = arith.constant 0.000000e+00 : f32
      %54 = vector.broadcast %cst_44 : f32 to vector<1x1x128xf32>
      %c0_45 = arith.constant 0 : index
      %c0_46 = arith.constant 0 : index
      %c0_47 = arith.constant 0 : index
      %55 = vector.load %arg6[%c0_45, %c0_46, %c0_47] : memref<1x1x128xf32, #tpu.memory_space<vmem>>, vector<1x1x128xf32>
      tpu.vector_store %arg6[%c0_45, %c0_46, %c0_47], %54 {strides = array<i32>} : memref<1x1x128xf32, #tpu.memory_space<vmem>>, vector<1x1x128xf32>,
    } else {
    }
    %c0 = arith.constant 0 : index
    %c0_1 = arith.constant 0 : index
    %c0_2 = arith.constant 0 : index
    %3 = vector.load %arg2[%c0, %c0_1, %c0_2] : memref<1x16x4xbf16, #tpu.memory_space<vmem>>, vector<1x16x4xbf16>
    %4 = vector.shape_cast %3 : vector<1x16x4xbf16> to vector<16x4xbf16>
    %c0_3 = arith.constant 0 : index
    %c0_4 = arith.constant 0 : index
    %5 = vector.load %arg7[%c0_3, %c0_4] : memref<24x4xbf16, #tpu.memory_space<vmem>>, vector<16x4xbf16>
    tpu.vector_store %arg7[%c0_3, %c0_4], %4 {strides = array<i32>} : memref<24x4xbf16, #tpu.memory_space<vmem>>, vector<16x4xbf16>,
    %c0_5 = arith.constant 0 : index
    %c0_6 = arith.constant 0 : index
    %c0_7 = arith.constant 0 : index
    %6 = vector.load %arg3[%c0_5, %c0_6, %c0_7] : memref<1x8x4xbf16, #tpu.memory_space<vmem>>, vector<1x8x4xbf16>
    %7 = vector.shape_cast %6 : vector<1x8x4xbf16> to vector<8x4xbf16>
    %c16 = arith.constant 16 : index
    %c0_8 = arith.constant 0 : index
    %8 = vector.load %arg7[%c16, %c0_8] : memref<24x4xbf16, #tpu.memory_space<vmem>>, vector<8x4xbf16>
    tpu.vector_store %arg7[%c16, %c0_8], %7 {strides = array<i32>} : memref<24x4xbf16, #tpu.memory_space<vmem>>, vector<8x4xbf16>,
    %cst = arith.constant 0.000000e+00 : f32
    %9 = vector.broadcast %cst : f32 to vector<16x128xf32>
    %c0_9 = arith.constant 0 : index
    %c0_10 = arith.constant 0 : index
    %10 = vector.load %arg7[%c0_9, %c0_10] : memref<24x4xbf16, #tpu.memory_space<vmem>>, vector<16x4xbf16>
    %c0_11 = arith.constant 0 : index
    %c0_12 = arith.constant 0 : index
    %c0_13 = arith.constant 0 : index
    %11 = vector.load %arg4[%c0_11, %c0_12, %c0_13] : memref<3x4x128xbf16, #tpu.memory_space<vmem>>, vector<1x4x128xbf16>
    %12 = vector.shape_cast %11 : vector<1x4x128xbf16> to vector<4x128xbf16>
    %cst_14 = arith.constant dense<0.000000e+00> : vector<16x128xf32>
    %13 = tpu.matmul %10, %12, %cst_14 {dimension_numbers = #tpu.dot_dimension_numbers<[1], [0], [0], [1], [0, 0, 1, 1], [], []>} : vector<16x4xbf16>, vector<4x128xbf16>, vector<16x128xf32> -> vector<16x128xf32>
    %14 = arith.addf %9, %13 : vector<16x128xf32>
    %c1 = arith.constant 1 : index
    %c0_15 = arith.constant 0 : index
    %15 = vector.load %arg7[%c1, %c0_15] : memref<24x4xbf16, #tpu.memory_space<vmem>>, vector<16x4xbf16>
    %c1_16 = arith.constant 1 : index
    %c0_17 = arith.constant 0 : index
    %c0_18 = arith.constant 0 : index
    %16 = vector.load %arg4[%c1_16, %c0_17, %c0_18] : memref<3x4x128xbf16, #tpu.memory_space<vmem>>, vector<1x4x128xbf16>
    %17 = vector.shape_cast %16 : vector<1x4x128xbf16> to vector<4x128xbf16>
    %cst_19 = arith.constant dense<0.000000e+00> : vector<16x128xf32>
    %18 = tpu.matmul %15, %17, %cst_19 {dimension_numbers = #tpu.dot_dimension_numbers<[1], [0], [0], [1], [0, 0, 1, 1], [], []>} : vector<16x4xbf16>, vector<4x128xbf16>, vector<16x128xf32> -> vector<16x128xf32>
    %19 = arith.addf %14, %18 : vector<16x128xf32>
    %c2 = arith.constant 2 : index
    %c0_20 = arith.constant 0 : index
    %20 = vector.load %arg7[%c2, %c0_20] : memref<24x4xbf16, #tpu.memory_space<vmem>>, vector<16x4xbf16>
    %c2_21 = arith.constant 2 : index
    %c0_22 = arith.constant 0 : index
    %c0_23 = arith.constant 0 : index
    %21 = vector.load %arg4[%c2_21, %c0_22, %c0_23] : memref<3x4x128xbf16, #tpu.memory_space<vmem>>, vector<1x4x128xbf16>
    %22 = vector.shape_cast %21 : vector<1x4x128xbf16> to vector<4x128xbf16>
    %cst_24 = arith.constant dense<0.000000e+00> : vector<16x128xf32>
    %23 = tpu.matmul %20, %22, %cst_24 {dimension_numbers = #tpu.dot_dimension_numbers<[1], [0], [0], [1], [0, 0, 1, 1], [], []>} : vector<16x4xbf16>, vector<4x128xbf16>, vector<16x128xf32> -> vector<16x128xf32>
    %24 = arith.addf %19, %23 : vector<16x128xf32>
    %c16_i32 = arith.constant 16 : i32
    %25 = arith.muli %arg1, %c16_i32 : i32
    %26 = tpu.iota {dimensions = array<i32: 0>} : vector<16x1xi32>
    %27 = vector.broadcast %25 : i32 to vector<16x1xi32>
    %28 = arith.addi %27, %26 : vector<16x1xi32>
    %c16_i32_25 = arith.constant 16 : i32
    %29 = vector.broadcast %c16_i32_25 : i32 to vector<16x1xi32>
    %30 = arith.cmpi slt, %28, %29 : vector<16x1xi32>
    %31 = arith.extui %30 : vector<16x1xi1> to vector<16x1xi32>
    %32 = arith.sitofp %31 : vector<16x1xi32> to vector<16x1xf32>
    %33 = vector.broadcast %32 : vector<16x1xf32> to vector<16x128xf32>
    %34 = arith.mulf %24, %33 : vector<16x128xf32>
    %c0_26 = arith.constant 0 : index
    %c0_27 = arith.constant 0 : index
    %c0_28 = arith.constant 0 : index
    %35 = vector.load %arg5[%c0_26, %c0_27, %c0_28] : memref<1x1x128xf32, #tpu.memory_space<vmem>>, vector<1x1x128xf32>
    %36 = vector.shape_cast %35 : vector<1x1x128xf32> to vector<1x128xf32>
    %cst_29 = arith.constant dense<0.000000e+00> : vector<128xf32>
    %37 = vector.multi_reduction <add>, %34, %cst_29 [0] : vector<16x128xf32> to vector<128xf32>
    %38 = vector.shape_cast %37 : vector<128xf32> to vector<1x128xf32>
    %39 = arith.addf %36, %38 : vector<1x128xf32>
    %c0_30 = arith.constant 0 : index
    %c0_31 = arith.constant 0 : index
    %c0_32 = arith.constant 0 : index
    %40 = vector.load %arg5[%c0_30, %c0_31, %c0_32] : memref<1x1x128xf32, #tpu.memory_space<vmem>>, vector<1x1x128xf32>
    %41 = vector.shape_cast %40 : vector<1x1x128xf32> to vector<1x128xf32>
    %42 = vector.shape_cast %39 : vector<1x128xf32> to vector<1x1x128xf32>
    tpu.vector_store %arg5[%c0_30, %c0_31, %c0_32], %42 {strides = array<i32>} : memref<1x1x128xf32, #tpu.memory_space<vmem>>, vector<1x1x128xf32>,
    %c0_33 = arith.constant 0 : index
    %c0_34 = arith.constant 0 : index
    %c0_35 = arith.constant 0 : index
    %43 = vector.load %arg6[%c0_33, %c0_34, %c0_35] : memref<1x1x128xf32, #tpu.memory_space<vmem>>, vector<1x1x128xf32>
    %44 = vector.shape_cast %43 : vector<1x1x128xf32> to vector<1x128xf32>
    %45 = arith.mulf %34, %24 : vector<16x128xf32>
    %cst_36 = arith.constant dense<0.000000e+00> : vector<128xf32>
    %46 = vector.multi_reduction <add>, %45, %cst_36 [0] : vector<16x128xf32> to vector<128xf32>
    %47 = vector.shape_cast %46 : vector<128xf32> to vector<1x128xf32>
    %48 = arith.addf %44, %47 : vector<1x128xf32>
    %c0_37 = arith.constant 0 : index
    %c0_38 = arith.constant 0 : index
    %c0_39 = arith.constant 0 : index
    %49 = vector.load %arg6[%c0_37, %c0_38, %c0_39] : memref<1x1x128xf32, #tpu.memory_space<vmem>>, vector<1x1x128xf32>
    %50 = vector.shape_cast %49 : vector<1x1x128xf32> to vector<1x128xf32>
    %51 = vector.shape_cast %48 : vector<1x128xf32> to vector<1x1x128xf32>
    tpu.vector_store %arg6[%c0_37, %c0_38, %c0_39], %51 {strides = array<i32>} : memref<1x1x128xf32, #tpu.memory_space<vmem>>, vector<1x1x128xf32>,
    return
  }
  func.func @transform_0(%arg0: i32, %arg1: i32) -> (i32, i32, i32) {
    %c0_i32 = arith.constant 0 : i32
    %c0_i32_0 = arith.constant 0 : i32
    return %arg0, %arg1, %c0_i32 : i32, i32, i32
  }
  func.func @transform_1(%arg0: i32, %arg1: i32) -> (i32, i32, i32) {
    %c1_i32 = arith.constant 1 : i32
    %0 = arith.addi %arg1, %c1_i32 : i32
    %c2_i32 = arith.constant 2 : i32
    %1 = arith.muli %0, %c2_i32 : i32
    %c0_i32 = arith.constant 0 : i32
    %c0_i32_0 = arith.constant 0 : i32
    return %arg0, %1, %c0_i32 : i32, i32, i32
  }
  func.func @transform_2(%arg0: i32, %arg1: i32) -> (i32, i32, i32) {
    %c0_i32 = arith.constant 0 : i32
    %c0_i32_0 = arith.constant 0 : i32
    %c0_i32_1 = arith.constant 0 : i32
    %c0_i32_2 = arith.constant 0 : i32
    return %c0_i32, %c0_i32_0, %c0_i32_1 : i32, i32, i32
  }
  func.func @transform_3(%arg0: i32, %arg1: i32) -> (i32, i32, i32) {
    %c0_i32 = arith.constant 0 : i32
    %c0_i32_0 = arith.constant 0 : i32
    %c0_i32_1 = arith.constant 0 : i32
    return %arg0, %c0_i32, %c0_i32_0 : i32, i32, i32
  }
  func.func @transform_4(%arg0: i32, %arg1: i32) -> (i32, i32, i32) {
    %c0_i32 = arith.constant 0 : i32
    %c0_i32_0 = arith.constant 0 : i32
    %c0_i32_1 = arith.constant 0 : i32
    return %arg0, %c0_i32, %c0_i32_0 : i32, i32, i32
  }
}

</mosaic_0001>

<bundles_post_ra>
// kernel: tpu_custom_call.1
= control target key start
LH: loop header
LB: loop body
LE: loop exit
PB: predicated region body
PF: predicated region fallthrough
CT: control target
= control target key end

     0   :  { %10 = vsyncpa [#allocation4], 0  ;;  %s1102_s0 = inlined_call_operand.vmem [shape: bf16[2,24,4], index: 0, kind: input, shape index: {}]   ;;  %s1103_s1 = inlined_call_operand.vmem [shape: bf16[2,24,4], index: 1, kind: input, shape index: {}]   ;;  %s1104_s2 = inlined_call_operand.vmem [shape: bf16[3,4,128], index: 2, kind: input, shape index: {}]   ;;  %s1105_s3 = inlined_call_operand.hbm [shape: f32[2,1,128], index: 3, kind: output, shape index: {0}]   ;;  %s1106_s4 = inlined_call_operand.hbm [shape: f32[2,1,128], index: 4, kind: output, shape index: {1}]  }
   0x1   :  { %12 = vsyncpa [#allocation4 + $0x1], 0 }
   0x2   :  { %13 = vsyncpa [#allocation6], 0 }
   0x3   :  { %15 = vsyncpa [#allocation6 + $0x1], 0  ;;  %s925_s15 = smov 0   ;;  %s927_s16 = smov 0  }
   0x4   :  { %s929_s17 = smov 0   ;;  %s931_s18 = smov 0  }
   0x5   :  { %s933_s19 = smov 0   ;;  %s935_s20 = smov 0  }
   0x6 LB: > { %s675_s21 = sadd.s32 4294967295, %s894_s20   ;;  %s676_s22 = sadd.s32 4294967294, %s894_s20   ;;  %s894_s20 = sphi %s935_s20, %s21_s20   ;;  %s890_s19 = sphi %s933_s19, %s1113_s19   ;;  %s886_s18 = sphi %s931_s18, %s1112_s18   ;;  %s882_s17 = sphi %s929_s17, %s1111_s17   ;;  %s878_s16 = sphi %s927_s16, %s1110_s16   ;;  %s874_s15 = sphi %s925_s15, %s1109_s15  }
   0x7   : > { %s33_s23 = sadd.s32 1, %s890_s19  ;;  %s121_s24 = sadd.s32 1, %s882_s17 }
   0x8   : > { %p35_p0 = scmp.ge.s32.totalorder %s33_s23, 2  ;;  %p131_p1 = scmp.ne.s32.totalorder %s882_s17, %s878_s16 }
   0x9   : > { %p132_p2 = scmp.eq.s32.totalorder %s675_s21, 1  ;;  %p137_p3 = scmp.ne.s32.totalorder %s878_s16, %s874_s15 }
   0xa   : > { %s1115_s23 = smov (%p35_p0, %s33_s23), 0  ;;  %p138_p5 = scmp.eq.s32.totalorder %s676_s22, 1 }
   0xb   : > { %p965_p4 = por %p132_p2, %p131_p1  ;;  %s118_s26 = ssub.s32 %s890_s19, %s1115_s23 }
   0xc   : > { %p679_p6 = scmp.ge.s32.totalorder %s894_s20, 1  ;;  %p119_p7 = scmp.eq.s32.totalorder %s118_s26, 0 }
   0xd   : > { %p972_p8 = por %p138_p5, %p137_p3  ;;  %p221_p9 = scmp.lt.s32.totalorder %s894_s20, 3 }
   0xe   : > { %s978_s28 = scalar_select %p119_p7, %s882_s17, %s121_s24  }
   0xf   : > { %p222_p10 = pnand %p679_p6, %p221_p9 }
  0x10   : > { %p273_p11 = scmp.lt.s32.totalorder (!%p222_p10), %s886_s18, 1  ;;  %s1007_s26 = sand.u32 (!%p222_p10), 1, %s878_s16  }
  0x11   : > { %225 = sbr.rel (%p222_p10) target bundleno = 304 (0x130), region = 32  ;;  %s1010_s29 = scalar_lea.vmem (!%p222_p10), [#allocation3], %s1007_s26 }
  0x12   : > { %s1014_s30 = scalar_lea.vmem (!%p222_p10), [#allocation5], %s1007_s26  ;;  %s690_s5 = sshll.u32 (!%p222_p10), %s886_s18, 4 }
  0x13   : > { %s547_s6 = sshll.u32 (!%p222_p10), %s1010_s29, 4  ;;  %s1025_s10 = scalar_lea.hbm (!%p222_p10), %s1105_s3, %s690_s5  ;;  %s1027_s6 = int_to_ptr.vmem [resolvable:$true] %s547_s6 }
  0x14   : > { %s531_s13 = scalar_lea.sflag (!%p222_p10), [#allocation4], %s1007_s26  ;;  %s788_s14 = scalar_lea.vmem (!%p222_p10), %s1027_s6, 16 }
  0x15   : > { %p789_p12 = scmp.ne.s32.totalorder (!%p222_p10), %s1027_s6, %s788_s14 }
  0x16   : > { %v682_v0 = vld [vmem:[%s1104_s2 + $0x2] sm:$0x3]  ;;  %vm343_vm0 = vcmask 1041408   ;;  %v314_v1 = vld [vmem:[%s1104_s2] sm:$0x3]  ;;  %v896_v2 = vmov 0.0  }
  0x17   : > { %702 = vmatprep.subr.bf16.mxu0 %v896_v2  ;;  %v345_v3 = vsel %vm343_vm0, %v682_v0, 0  ;;  %708 = vmatprep.subr.bf16.mxu1 %v896_v2  ;;  %v391_v4 = vsel %vm343_vm0, %v314_v1, 0  ;;  %vm897_vm1 = vmmov 0   ;;  %s274_s7 = scalar_select %p273_p11, %s886_s18, 1  ;;  %vm307_vm2 = vcmask 27648   ;;  %303 = vst [vmem:[%s1010_s29] sm:$0x1] %v896_v2 }
  0x18   : > { %703 = vmatpush3.bf16.msra.mxu0 %v345_v3  ;;  %709 = vmatpush3.bf16.msra.mxu1 %v391_v4  ;;  %vm339_vm3 = vcmask 31744   ;;  %v687_v18 = vld [vmem:[%s1104_s2 + $0x4] sm:$0x3]  ;;  %vm326_vm4 = vsmask.f32 7424  ;;  %vm440_vm5 = vcmask 1046528   ;;  %p790_p13 = pnand %p789_p12, %p965_p4 }
  0x19   : > { %704 = vmatprep.mubr.msk.bf16.mxu0 %vm897_vm1, %v896_v2  ;;  %710 = vmatprep.mubr.msk.bf16.mxu1 %vm897_vm1, %v896_v2  ;;  %s720_s8 = smul.u32 12, %s274_s7  ;;  %v448_v21 = vsel %vm343_vm0, %v687_v18, 0  ;;  %304 = vst [vmem:[%s1014_s30] sm:$0x1] %v896_v2  ;;  %s560_s7 = sshll.u32 %s1014_s30, 4  ;;  %s1035_s7 = int_to_ptr.vmem [resolvable:$true] %s560_s7 }
  0x1a   : > { %714 = vmatprep.subr.bf16.mxu0 %v896_v2  ;;  %p791_p0 = pneg %p790_p13 }
  0x1b   : > { %s280_s11 = scalar_lea.vmem %s1102_s0, %s720_s8  ;;  %s695_s12 = sadd.s32 8, %s720_s8 }
  0x1c   : > { %s295_s21 = scalar_lea.vmem %s1103_s1, %s695_s12  ;;  %v305_v5 = vld [vmem:[%s280_s11] sm:$0xf]  ;;  %v306_v6 = vld [vmem:[%s280_s11 + $0x4] sm:$0xf]  ;;  %s1033_s12 = scalar_lea.hbm %s1106_s4, %s690_s5 }
  0x1d   : > { %308 = vst.msk [vmem:[#allocation2] sm:$0xf] %vm307_vm2, %v305_v5  ;;  %309 = vst.msk [vmem:[#allocation2 + $0x4] sm:$0xf] %vm307_vm2, %v306_v6  ;;  %v310_v7 = vld [vmem:[%s295_s21] sm:$0xf] }
  0x1e   : > { %311 = vst.msk [vmem:[#allocation2 + $0x8] sm:$0xf] %vm307_vm2, %v310_v7  ;;  %v508_v55 = vld [vmem:[%s1010_s29] sm:$0x1]  ;;  %s898_s21 = smov [#allocation3]  }
  0x1f   : > { %s792_s22 = sshll.u32 %s898_s21, 4  ;;  %s793_s22 = int_to_ptr.vmem [resolvable:$false] %s792_s22 }
  0x20   : > { %v518_v58 = vld [vmem:[%s1014_s30] sm:$0x1]  ;;  %s794_s24 = scalar_lea.vmem %s793_s22, 32  ;;  %p795_p1 = scmp.lt.s32.totalorder %s1027_s6, %s793_s22 }
  0x21   : > { %p796_p2 = scmp.lt.s32.totalorder %s794_s24, %s788_s14 }
  0x23   : > { %p797_p3 = por %p796_p2, %p795_p1 }
  0x24   : > { %v312_v8 = vld [vmem:[#allocation2] sm:$0xf]  ;;  %v313_v9 = vld [vmem:[#allocation2 + $0x4] sm:$0xf] }
  0x25   : > { %v683_v10 = vcombine.low %v312_v8, %v313_v9  ;;  %v786_v11 = vld [vmem:[#allocation2 + $0x8] ss:$0 sps:$4 sm:$0x11]   ;;  %v434_v15 = vld [vmem:[#allocation2] sm:$0xe]  ;;  %p798_p5 = pnand %p797_p3, %p791_p0 }
  0x26   : > { %v335_v14 = vshll.u32 %v786_v11, 16  ;;  %v688_v20 = vcombine.low %v434_v15, %v313_v9  ;;  %v442_v24 = vrot.slane %v786_v11, 1 }
  0x27   : > { %v328_v12 = vshrl.u32 %v683_v10, 16  ;;  %v330_v13 = vshll.u32 %v683_v10, 16  ;;  %711 = vmatmul.mubr.msk.bf16.vlgmr.msra.gmra.mxu1 %vm339_vm3, %v683_v10 }
  0x28   : > { %v337_v17 = vrot.slane %v335_v14, 1  ;;  %v441_v23 = vrot.slane %v688_v20, 1 }
  0x29   : > { %v332_v16 = vrot.slane %v330_v13, 1 }
  0x2a   : > { %v443_v25 = vsel %vm440_vm5, %v441_v23, %v442_v24 }
  0x2b   : > { %v333_v19 = vor.u32 %v332_v16, %v328_v12 }
  0x2d   : > { %v338_v22 = vsel %vm326_vm4, %v333_v19, %v337_v17 }
  0x2e   : > { %705 = vmatmul.mubr.msk.bf16.vlgmr.msra.gmra.mxu0 %vm339_vm3, %v338_v22 }
  0x2f   : > { %715 = vmatpush3.bf16.msra.mxu0 %v448_v21  ;;  %716 = vmatprep.mubr.msk.bf16.mxu0 %vm897_vm1, %v896_v2 }
  0x36   : > { %717 = vmatmul.mubr.msk.bf16.vlgmr.msra.gmra.mxu0 %vm339_vm3, %v443_v25 }
  0xe7   : > { %v427_v26 = vpop.f32.mrf.mxu1 }
  0xe9   : > { %v712_v27 = vpop.f32.mrf.mxu1 }
  0xeb   : > { %v430_v28 = vpop.f32.mrf.mxu1 }
  0xed   : > { %v713_v29 = vpop.f32.mrf.mxu1 }
  0xee   : > { %v381_v30 = vpop.f32.mrf.mxu0 }
  0xef   : > { %v428_v35 = vadd.f32 %v427_v26, %v381_v30 }
  0xf0   : > { %v706_v31 = vpop.f32.mrf.mxu0 }
  0xf2   : > { %v384_v32 = vpop.f32.mrf.mxu0 }
  0xf3   : > { %v431_v37 = vadd.f32 %v430_v28, %v384_v32 }
  0xf4   : > { %v707_v33 = vpop.f32.mrf.mxu0 }
  0xf6   : > { %v484_v34 = vpop.f32.mrf.mxu0 }
  0xf7   : > { %v491_v38 = vadd.f32 %v484_v34, %v428_v35 }
  0xf8   : > { %v718_v36 = vpop.f32.mrf.mxu0 }
  0xf9   : > { %v519_v42 = vmul.f32 %v491_v38, %v491_v38 }
  0xfa   : > { %v487_v39 = vpop.f32.mrf.mxu0 }
  0xfb   : > { %v492_v40 = vadd.f32 %v487_v39, %v431_v37 }
  0xfc   : > { %v719_v41 = vpop.f32.mrf.mxu0 }
  0xfd   : > { %v509_v43 = vadd.f32 %v492_v40, %v491_v38  ;;  %v520_v44 = vmul.f32 %v492_v40, %v492_v40 }
  0xff   : > { %v510_v45 = vrot.slane %v509_v43, 4  ;;  %v521_v46 = vadd.f32 %v520_v44, %v519_v42 }
 0x101   : > { %v511_v47 = vadd.f32 %v510_v45, %v509_v43  ;;  %v522_v48 = vrot.slane %v521_v46, 4 }
 0x103   : > { %v512_v49 = vrot.slane %v511_v47, 2  ;;  %v523_v50 = vadd.f32 %v522_v48, %v521_v46 }
 0x105   : > { %v513_v51 = vadd.f32 %v512_v49, %v511_v47  ;;  %v524_v52 = vrot.slane %v523_v50, 2 }
 0x107   : > { %v514_v53 = vrot.slane %v513_v51, 1  ;;  %v525_v54 = vadd.f32 %v524_v52, %v523_v50 }
 0x109   : > { %v515_v56 = vadd.f32 %v514_v53, %v513_v51  ;;  %v526_v57 = vrot.slane %v525_v54, 1 }
 0x10b   : > { %v516_v59 = vadd.f32 %v515_v56, %v508_v55  ;;  %v527_v60 = vadd.f32 %v526_v57, %v525_v54 }
 0x10d   : > { %517 = vst [vmem:[%s1010_s29] sm:$0x1] %v516_v59  ;;  %v528_v61 = vadd.f32 %v527_v60, %v518_v58 }
 0x10e   : > { %801 = shalt.err (!%p798_p5)
}
 0x10f   : > { %s802_s29 = scalar_lea.hbm %s1025_s10, 16  ;;  %s806_s9 = scalar_lea.hbm %s1105_s3, 32 }
 0x110   : > { %p803_p6 = scmp.ne.s32.totalorder %s1025_s10, %s802_s29  ;;  %p807_p10 = scmp.lt.s32.totalorder %s1025_s10, %s1105_s3 }
 0x111   : > { %p808_p11 = scmp.lt.s32.totalorder %s806_s9, %s802_s29 }
 0x112   : > { %p804_p7 = pnand %p803_p6, %p965_p4 }
 0x113   : > { %p809_p12 = por %p808_p11, %p807_p10 }
 0x114   : > { %p805_p9 = pneg %p804_p7 }
 0x116   : > { %p810_p13 = pnand %p809_p12, %p805_p9 }
 0x118   : > { %813 = shalt.err (!%p810_p13)
}
 0x119   : > { %722 = dma.vmem_to_hbm [thread:$0]  (%p965_p4), %s1027_s6, 16, %s1025_s10, %s531_s13   ;;  %529 = vst [vmem:[%s1014_s30] sm:$0x1] %v528_v61 }
 0x11a   : > { %s535_s14 = scalar_lea.sflag [#allocation6], %s1007_s26  ;;  %s814_s21 = scalar_lea.vmem %s1035_s7, 16 }
 0x11b   : > { %p815_p0 = scmp.ne.s32.totalorder %s1035_s7, %s814_s21  ;;  %s899_s22 = smov [#allocation5]  }
 0x11c   : > { %s818_s24 = sshll.u32 %s899_s22, 4  ;;  %s819_s24 = int_to_ptr.vmem [resolvable:$false] %s818_s24 }
 0x11d   : > { %p816_p1 = pnand %p815_p0, %p965_p4  ;;  %s820_s29 = scalar_lea.vmem %s819_s24, 32 }
 0x11e   : > { %p821_p3 = scmp.lt.s32.totalorder %s1035_s7, %s819_s24  ;;  %p822_p5 = scmp.lt.s32.totalorder %s820_s29, %s814_s21 }
 0x11f   : > { %p817_p2 = pneg %p816_p1 }
 0x120   : > { %p823_p6 = por %p822_p5, %p821_p3 }
 0x122   : > { %p824_p7 = pnand %p823_p6, %p817_p2 }
 0x124   : > { %827 = shalt.err (!%p824_p7)
}
 0x125   : > { %s828_s30 = scalar_lea.hbm %s1033_s12, 16  ;;  %s832_s10 = scalar_lea.hbm %s1106_s4, 32 }
 0x126   : > { %p829_p9 = scmp.ne.s32.totalorder %s1033_s12, %s828_s30  ;;  %p833_p12 = scmp.lt.s32.totalorder %s1033_s12, %s1106_s4 }
 0x127   : > { %p834_p13 = scmp.lt.s32.totalorder %s832_s10, %s828_s30 }
 0x128   : > { %p830_p10 = pnand %p829_p9, %p965_p4 }
 0x129   : > { %p835_p0 = por %p834_p13, %p833_p12 }
 0x12a   : > { %p831_p11 = pneg %p830_p10 }
 0x12c   : > { %p836_p1 = pnand %p835_p0, %p831_p11 }
 0x12e   : > { %839 = shalt.err (!%p836_p1)
}
 0x12f   : > { %723 = dma.vmem_to_hbm [thread:$0]  (%p965_p4), %s1035_s7, 16, %s1033_s12, %s535_s14  }
 0x130 PF: > { %p734_p2 = scmp.ge.s32.totalorder %s894_s20, 2  ;;  %s572_s8 = sand.u32 1, %s874_s15  }
 0x131   : > { %s573_s9 = scalar_lea.sflag [#allocation4], %s572_s8 }
 0x132   : > { %p727_p3 = pnand %p734_p2, %p972_p8 }
 0x134   : > { %p728_p5 = pneg %p727_p3 }
 0x136   : > { %865 = dma.done.wait (%p728_p5), %s573_s9, 16  }
 0x137   : > { %867 = vsyncadd (%p728_p5), %s573_s9, 4294967280  ;;  %s581_s18 = scalar_lea.sflag [#allocation6], %s572_s8 }
 0x138   : > { %869 = dma.done.wait (%p728_p5), %s581_s18, 16  }
 0x139   : > { %871 = vsyncadd (%p728_p5), %s581_s18, 4294967280  ;;  %s21_s20 = sadd.s32 1, %s894_s20   ;;  %s1109_s15 = smov %s878_s16 }
 0x13a   : > { %p18_p6 = scmp.ge.s32.totalorder %s21_s20, 4   ;;  %s1110_s16 = smov %s882_s17 }
 0x13b   : > { %s1111_s17 = smov %s978_s28  ;;  %s1112_s18 = smov %s890_s19 }
 0x13c   : > { %s1113_s19 = smov %s1115_s23  ;;  %20 = sbr.rel (!%p18_p6) target bundleno = 6 (0x6), region = 93 }
 0x141   :  { %585 = vsyncpa [#allocation4], 1 }
 0x142   :  { %587 = vsyncpa [#allocation4 + $0x1], 1 }
 0x143   :  { %588 = vsyncpa [#allocation6], 1 }
 0x144   :  { %590 = vsyncpa [#allocation6 + $0x1], 1 }

</bundles_post_ra>
